<compile_context>
chip_gen: v7x
topology: tpu7x:2x2x1
jax: 0.10.0
libtpu: 0.0.40
codegen_flags: <defaults>
</compile_context>

<pallas_src>
import jax
import jax.numpy as jnp
from jax.experimental import pallas as pl
from jax.experimental.pallas import tpu as pltpu

N_ACTIONS = 4
N_STATES = 15
H1 = 128
H2 = 32


def _round_up(n, m):
    return ((n + m - 1) // m) * m


def _mlp_kernel(x_ref, w1_ref, b1_ref, w2_ref, b2_ref, w3_ref, b3_ref, o_ref):
    # Cast x to bf16 in-kernel (hidden under DMA); all matmuls accumulate f32.
    x = x_ref[...].astype(jnp.bfloat16)
    # fc1 + relu
    h1 = jnp.dot(x, w1_ref[...], preferred_element_type=jnp.float32)
    h1 = jnp.maximum(h1 + b1_ref[...], 0.0)
    # fc2 + relu
    h2 = jnp.dot(h1.astype(jnp.bfloat16), w2_ref[...],
                 preferred_element_type=jnp.float32)
    h2 = jnp.maximum(h2 + b2_ref[...], 0.0)
    # out (no activation) -> narrow (TB, N_ACTIONS) store
    o = jnp.dot(h2.astype(jnp.bfloat16), w3_ref[...],
                preferred_element_type=jnp.float32)
    o_ref[...] = (o + b3_ref[...]).astype(o_ref.dtype)


def prepare_params(params):
    """One-time weight preprocessing (hoisted out of the forward call):
    bf16 MXU operands + 2-D f32 biases."""
    w1, b1, w2, b2, w3, b3 = params
    return (w1.astype(jnp.bfloat16), b1.reshape(1, H1).astype(jnp.float32),
            w2.astype(jnp.bfloat16), b2.reshape(1, H2).astype(jnp.float32),
            w3.astype(jnp.bfloat16), b3.reshape(1, N_ACTIONS).astype(jnp.float32))


def net_forward(x, prepared, *, block_b=1024):
    """x: (B, N_STATES) float32, prepared = prepare_params(params)
    -> (B, N_ACTIONS) float32."""
    w1b, b1r, w2b, b2r, w3b, b3r = prepared
    B = x.shape[0]

    # Batch tile: multiple of 8 (sublane), capped at block_b, and sized so
    # n_tiles >= 2 when B > 8 (keeps both v7x TensorCores busy).
    TB = _round_up(min(block_b, _round_up(max((B + 1) // 2, 1), 8)), 8)
    n_tiles = pl.cdiv(B, TB)

    # Constant index_map -> block never changes -> stays VMEM-resident.
    resident = lambda a: pl.BlockSpec(a.shape, lambda i: (0, 0))

    b_eff = n_tiles * TB
    flops = 2 * b_eff * (N_STATES * H1 + H1 * H2 + H2 * N_ACTIONS)
    bytes_accessed = int(
        x.size * 4 + B * N_ACTIONS * 4
        + (w1b.size + w2b.size + w3b.size) * 2
        + (b1r.size + b2r.size + b3r.size) * 4)

    out = pl.pallas_call(
        _mlp_kernel,
        out_shape=jax.ShapeDtypeStruct((B, N_ACTIONS), jnp.float32),
        grid=(n_tiles,),
        in_specs=[
            pl.BlockSpec((TB, N_STATES), lambda i: (i, 0)),  # x: batch-tiled
            resident(w1b), resident(b1r),
            resident(w2b), resident(b2r),
            resident(w3b), resident(b3r),
        ],
        out_specs=pl.BlockSpec((TB, N_ACTIONS), lambda i: (i, 0)),
        compiler_params=pltpu.CompilerParams(
            dimension_semantics=("parallel",)),  # v7x: shard batch over both TCs
        cost_estimate=pl.CostEstimate(flops=int(flops), transcendentals=0,
                                      bytes_accessed=bytes_accessed),
    )(x, w1b, b1r, w2b, b2r, w3b, b3r)

    return out


def init_params(key):
    """Mirrors the PyTorch module: weights ~ N(0, 0.1); biases use PyTorch's
    Linear default U(-1/sqrt(fan_in), 1/sqrt(fan_in))."""
    ks = jax.random.split(key, 10)

    def linear(kw, kb, fan_in, fan_out):
        # stored as (in, out) so the kernel does x @ W
        w = 0.1 * jax.random.normal(kw, (fan_in, fan_out), jnp.float32)
        bound = 1.0 / jnp.sqrt(jnp.float32(fan_in))
        b = jax.random.uniform(kb, (fan_out,), jnp.float32, -bound, bound)
        return w, b

    w1, b1 = linear(ks[0], ks[1], N_STATES, H1)    # fc1
    w2, b2 = linear(ks[2], ks[3], H1, H2)          # fc2
    _ = linear(ks[4], ks[5], 256, 64)              # fc3 (unused in forward)
    _ = linear(ks[6], ks[7], 64, 32)               # fc4 (unused in forward)
    wo, bo = linear(ks[8], ks[9], H2, N_ACTIONS)   # out
    return (w1, b1, w2, b2, wo, bo)


def net_forward_ref(x, params):
    """Reference computed with the same bf16-operand / f32-accumulate math."""
    w1, b1, w2, b2, w3, b3 = params
    bf = jnp.bfloat16
    h1 = jnp.maximum(jnp.dot(x.astype(bf), w1.astype(bf),
                             preferred_element_type=jnp.float32) + b1, 0.0)
    h2 = jnp.maximum(jnp.dot(h1.astype(bf), w2.astype(bf),
                             preferred_element_type=jnp.float32) + b2, 0.0)
    return jnp.dot(h2.astype(bf), w3.astype(bf),
                   preferred_element_type=jnp.float32) + b3


def net_forward_ref_f32(x, params):
    """Pure f32 reference (sanity check for bf16 cast error)."""
    w1, b1, w2, b2, w3, b3 = params
    h1 = jnp.maximum(x @ w1 + b1, 0.0)
    h2 = jnp.maximum(h1 @ w2 + b2, 0.0)
    return h2 @ w3 + b3


if __name__ == "__main__":
    key = jax.random.PRNGKey(0)
    kx, kx2, kp = jax.random.split(key, 3)
    params = init_params(kp)
    prepared = prepare_params(params)

    # Small case (B=2): single partial block (TB=8 > B), OOB rows masked.
    B = 2
    x = jax.random.normal(kx, (B, N_STATES), jnp.float32)
    out = jax.block_until_ready(net_forward(x, prepared))
    assert out.shape == (B, N_ACTIONS)
    assert jnp.allclose(out, net_forward_ref(x, params), atol=2e-3, rtol=2e-3)
    assert jnp.allclose(out, net_forward_ref_f32(x, params), atol=5e-2, rtol=5e-2)

    # Multi-tile case: exercises the batch grid + uneven trailing block
    # (300 rows, TB=128 -> 3 tiles, last tile has 44 valid rows).
    B2 = 300
    x2 = jax.random.normal(kx2, (B2, N_STATES), jnp.float32)
    out2 = jax.block_until_ready(net_forward(x2, prepared, block_b=128))
    assert out2.shape == (B2, N_ACTIONS)
    assert jnp.allclose(out2, net_forward_ref(x2, params), atol=2e-3, rtol=2e-3)

    print("KERNEL_OK")
</pallas_src>

<mosaic_0001>
module attributes {stable_mosaic.version = 11 : i64} {
  func.func @_mlp_kernel(%arg0: i32, %arg1: memref<8x15xf32, #tpu.memory_space<vmem>>, %arg2: memref<15x128xbf16, #tpu.memory_space<vmem>>, %arg3: memref<1x128xf32, #tpu.memory_space<vmem>>, %arg4: memref<128x32xbf16, #tpu.memory_space<vmem>>, %arg5: memref<1x32xf32, #tpu.memory_space<vmem>>, %arg6: memref<32x4xbf16, #tpu.memory_space<vmem>>, %arg7: memref<1x4xf32, #tpu.memory_space<vmem>>, %arg8: memref<8x4xf32, #tpu.memory_space<vmem>>) attributes {dimension_semantics = [#tpu.dimension_semantics<parallel>], iteration_bounds = array<i64: 1>, scalar_prefetch = 0 : i64, scratch_operands = 0 : i64, tpu.core_type = #tpu.core_type<tc>, window_params = [{transform_indices = @transform_0, window_bounds = array<i64: 8, 15>}, {pipeline_mode = #tpu.pipeline_mode<synchronous>, transform_indices = @transform_1, window_bounds = array<i64: 15, 128>}, {pipeline_mode = #tpu.pipeline_mode<synchronous>, transform_indices = @transform_2, window_bounds = array<i64: 1, 128>}, {pipeline_mode = #tpu.pipeline_mode<synchronous>, transform_indices = @transform_3, window_bounds = array<i64: 128, 32>}, {pipeline_mode = #tpu.pipeline_mode<synchronous>, transform_indices = @transform_4, window_bounds = array<i64: 1, 32>}, {pipeline_mode = #tpu.pipeline_mode<synchronous>, transform_indices = @transform_5, window_bounds = array<i64: 32, 4>}, {pipeline_mode = #tpu.pipeline_mode<synchronous>, transform_indices = @transform_6, window_bounds = array<i64: 1, 4>}, {transform_indices = @transform_7, window_bounds = array<i64: 8, 4>}]} {
    %c0 = arith.constant 0 : index
    %c0_0 = arith.constant 0 : index
    %0 = vector.load %arg1[%c0, %c0_0] : memref<8x15xf32, #tpu.memory_space<vmem>>, vector<8x15xf32>
    %1 = arith.truncf %0 : vector<8x15xf32> to vector<8x15xbf16>
    %c0_1 = arith.constant 0 : index
    %c0_2 = arith.constant 0 : index
    %2 = vector.load %arg2[%c0_1, %c0_2] : memref<15x128xbf16, #tpu.memory_space<vmem>>, vector<15x128xbf16>
    %cst = arith.constant dense<0.000000e+00> : vector<8x128xf32>
    %3 = tpu.matmul %1, %2, %cst {dimension_numbers = #tpu.dot_dimension_numbers<[1], [0], [0], [1], [0, 0, 1, 1], [], []>} : vector<8x15xbf16>, vector<15x128xbf16>, vector<8x128xf32> -> vector<8x128xf32>
    %c0_3 = arith.constant 0 : index
    %c0_4 = arith.constant 0 : index
    %4 = vector.load %arg3[%c0_3, %c0_4] : memref<1x128xf32, #tpu.memory_space<vmem>>, vector<1x128xf32>
    %5 = vector.broadcast %4 : vector<1x128xf32> to vector<8x128xf32>
    %6 = arith.addf %3, %5 : vector<8x128xf32>
    %cst_5 = arith.constant 0.000000e+00 : f32
    %7 = vector.broadcast %cst_5 : f32 to vector<8x128xf32>
    %8 = arith.maximumf %6, %7 : vector<8x128xf32>
    %9 = arith.truncf %8 : vector<8x128xf32> to vector<8x128xbf16>
    %c0_6 = arith.constant 0 : index
    %c0_7 = arith.constant 0 : index
    %10 = vector.load %arg4[%c0_6, %c0_7] : memref<128x32xbf16, #tpu.memory_space<vmem>>, vector<128x32xbf16>
    %cst_8 = arith.constant dense<0.000000e+00> : vector<8x32xf32>
    %11 = tpu.matmul %9, %10, %cst_8 {dimension_numbers = #tpu.dot_dimension_numbers<[1], [0], [0], [1], [0, 0, 1, 1], [], []>} : vector<8x128xbf16>, vector<128x32xbf16>, vector<8x32xf32> -> vector<8x32xf32>
    %c0_9 = arith.constant 0 : index
    %c0_10 = arith.constant 0 : index
    %12 = vector.load %arg5[%c0_9, %c0_10] : memref<1x32xf32, #tpu.memory_space<vmem>>, vector<1x32xf32>
    %13 = vector.broadcast %12 : vector<1x32xf32> to vector<8x32xf32>
    %14 = arith.addf %11, %13 : vector<8x32xf32>
    %cst_11 = arith.constant 0.000000e+00 : f32
    %15 = vector.broadcast %cst_11 : f32 to vector<8x32xf32>
    %16 = arith.maximumf %14, %15 : vector<8x32xf32>
    %17 = arith.truncf %16 : vector<8x32xf32> to vector<8x32xbf16>
    %c0_12 = arith.constant 0 : index
    %c0_13 = arith.constant 0 : index
    %18 = vector.load %arg6[%c0_12, %c0_13] : memref<32x4xbf16, #tpu.memory_space<vmem>>, vector<32x4xbf16>
    %cst_14 = arith.constant dense<0.000000e+00> : vector<8x4xf32>
    %19 = tpu.matmul %17, %18, %cst_14 {dimension_numbers = #tpu.dot_dimension_numbers<[1], [0], [0], [1], [0, 0, 1, 1], [], []>} : vector<8x32xbf16>, vector<32x4xbf16>, vector<8x4xf32> -> vector<8x4xf32>
    %c0_15 = arith.constant 0 : index
    %c0_16 = arith.constant 0 : index
    %20 = vector.load %arg7[%c0_15, %c0_16] : memref<1x4xf32, #tpu.memory_space<vmem>>, vector<1x4xf32>
    %21 = vector.broadcast %20 : vector<1x4xf32> to vector<8x4xf32>
    %22 = arith.addf %19, %21 : vector<8x4xf32>
    %c0_17 = arith.constant 0 : index
    %c0_18 = arith.constant 0 : index
    %23 = vector.load %arg8[%c0_17, %c0_18] : memref<8x4xf32, #tpu.memory_space<vmem>>, vector<8x4xf32>
    tpu.vector_store %arg8[%c0_17, %c0_18], %22 {strides = array<i32>} : memref<8x4xf32, #tpu.memory_space<vmem>>, vector<8x4xf32>,
    return
  }
  func.func @transform_0(%arg0: i32) -> (i32, i32) {
    %c0_i32 = arith.constant 0 : i32
    %c0_i32_0 = arith.constant 0 : i32
    return %arg0, %c0_i32 : i32, i32
  }
  func.func @transform_1(%arg0: i32) -> (i32, i32) {
    %c0_i32 = arith.constant 0 : i32
    %c0_i32_0 = arith.constant 0 : i32
    %c0_i32_1 = arith.constant 0 : i32
    return %c0_i32, %c0_i32_0 : i32, i32
  }
  func.func @transform_2(%arg0: i32) -> (i32, i32) {
    %c0_i32 = arith.constant 0 : i32
    %c0_i32_0 = arith.constant 0 : i32
    %c0_i32_1 = arith.constant 0 : i32
    return %c0_i32, %c0_i32_0 : i32, i32
  }
  func.func @transform_3(%arg0: i32) -> (i32, i32) {
    %c0_i32 = arith.constant 0 : i32
    %c0_i32_0 = arith.constant 0 : i32
    %c0_i32_1 = arith.constant 0 : i32
    return %c0_i32, %c0_i32_0 : i32, i32
  }
  func.func @transform_4(%arg0: i32) -> (i32, i32) {
    %c0_i32 = arith.constant 0 : i32
    %c0_i32_0 = arith.constant 0 : i32
    %c0_i32_1 = arith.constant 0 : i32
    return %c0_i32, %c0_i32_0 : i32, i32
  }
  func.func @transform_5(%arg0: i32) -> (i32, i32) {
    %c0_i32 = arith.constant 0 : i32
    %c0_i32_0 = arith.constant 0 : i32
    %c0_i32_1 = arith.constant 0 : i32
    return %c0_i32, %c0_i32_0 : i32, i32
  }
  func.func @transform_6(%arg0: i32) -> (i32, i32) {
    %c0_i32 = arith.constant 0 : i32
    %c0_i32_0 = arith.constant 0 : i32
    %c0_i32_1 = arith.constant 0 : i32
    return %c0_i32, %c0_i32_0 : i32, i32
  }
  func.func @transform_7(%arg0: i32) -> (i32, i32) {
    %c0_i32 = arith.constant 0 : i32
    %c0_i32_0 = arith.constant 0 : i32
    return %arg0, %c0_i32 : i32, i32
  }
}

</mosaic_0001>

<bundles_post_ra>
// kernel: tpu_custom_call.1
= control target key start
LH: loop header
LB: loop body
LE: loop exit
PB: predicated region body
PF: predicated region fallthrough
CT: control target
= control target key end

     0   :  { %12 = vsyncpa [#allocation3], 0  ;;  %v400_v1 = vmov 0.0   ;;  %vm48_vm0 = vcmask 1046528   ;;  %vm49_vm1 = vcmask 1047552   ;;  %v401_v2 = vmov 65535   ;;  %s506_s0 = inlined_call_operand.vmem [shape: f32[2,15], index: 0, kind: input, shape index: {}]   ;;  %s507_s1 = inlined_call_operand.vmem [shape: bf16[15,128], index: 1, kind: input, shape index: {}]   ;;  %s508_s2 = inlined_call_operand.vmem [shape: f32[1,128], index: 2, kind: input, shape index: {}]   ;;  %s509_s3 = inlined_call_operand.vmem [shape: bf16[128,32], index: 3, kind: input, shape index: {}]   ;;  %s510_s4 = inlined_call_operand.vmem [shape: f32[1,32], index: 4, kind: input, shape index: {}]   ;;  %s511_s5 = inlined_call_operand.vmem [shape: bf16[32,4], index: 5, kind: input, shape index: {}]   ;;  %s512_s6 = inlined_call_operand.vmem [shape: f32[1,4], index: 6, kind: input, shape index: {}]   ;;  %s513_s7 = inlined_call_operand.hbm [shape: f32[2,4], index: 7, kind: output, shape index: {}]  }
   0x1   :  { %v365_v0 = vld [vmem:[%s507_s1] sm:$0xff]   ;;  %325 = vmatprep.subr.bf16.mxu0 %v400_v1  ;;  %331 = vmatprep.subr.bf16.mxu1 %v400_v1  ;;  %v50_v3 = vsel %vm48_vm0, 4294967295, %v401_v2  ;;  %vm402_vm2 = vmmov 0   ;;  %v367_v7 = vld [vmem:[%s509_s3 + $0x8] sm:$0xff]   ;;  %vm44_vm3 = vcmask 121856   ;;  %v368_v10 = vld [vmem:[%s509_s3 + $0x10] sm:$0xff]  }
   0x2   :  { %327 = vmatprep.mubr.msk.bf16.mxu0 %vm402_vm2, %v400_v1  ;;  %v28_v4 = vld [vmem:[%s506_s0] sm:$0xff]  ;;  %347 = vmatprep.mubr.msk.bf16.mxu1 %vm402_vm2, %v400_v1  ;;  %v51_v6 = vsel %vm49_vm1, %v50_v3, 0  ;;  %v369_v11 = vld [vmem:[%s509_s3 + $0x18] sm:$0xff]   ;;  %v371_v13 = vld [vmem:[%s509_s3 + $0x28] sm:$0xff]   ;;  %vm233_vm4 = vcmask 261120   ;;  %vm277_vm5 = vcmask 31744  }
   0x3   :  { %v366_v5 = vld [vmem:[%s509_s3] sm:$0xff]   ;;  %v53_v8 = vand.u32 %v365_v0, %v51_v6  ;;  %v29_v9 = vpack.c.bf16 %v28_v4, %v28_v4  ;;  %v372_v14 = vld [vmem:[%s509_s3 + $0x30] sm:$0xff]   ;;  %v373_v15 = vld [vmem:[%s509_s3 + $0x38] sm:$0xff]  }
   0x4   :  { %332 = vmatpush3.bf16.msra.mxu1 %v366_v5  ;;  %v370_v12 = vld [vmem:[%s509_s3 + $0x20] sm:$0xff]   ;;  %v375_v25 = vld [vmem:[%s511_s5 + $0x8] sm:$0xff]  }
   0x5   :  { %333 = vmatprep.subr.bf16.mxu1 %v400_v1  ;;  %326 = vmatpush3.bf16.msra.mxu0 %v53_v8  ;;  %v374_v16 = vld [vmem:[%s511_s5] sm:$0xff]  }
   0x6   :  { %351 = vmatprep.subr.bf16.mxu0 %v400_v1  ;;  %v295_v17 = vld [vmem:[%s508_s2] ss:$0 sm:$0xff] }
   0x7   :  { %v298_v26 = vld [vmem:[%s510_s4] ss:$0 sm:$0xff] }
   0x8   :  { %334 = vmatpush3.bf16.msra.mxu1 %v367_v7  ;;  %328 = vmatmul.mubr.msk.bf16.vlgmr.msra.gmra.mrb[0].mxu0 %vm44_vm3, %v29_v9  ;;  %v307_v34 = vld [vmem:[%s512_s6] ss:$0 sm:$0xff] }
   0x9   :  { %335 = vmatprep.subr.bf16.mxu1 %v400_v1  ;;  %355 = vmatprep.mubr.msk.bf16.mxu0 %vm402_vm2, %v400_v1 }
   0xa   :  { %352 = vmatpush3.bf16.msra.mxu0 %v374_v16 }
   0xb   :  { %353 = vmatprep.subr.bf16.mxu0 %v400_v1 }
   0xc   :  { %336 = vmatpush3.bf16.msra.mxu1 %v368_v10 }
   0xd   :  { %337 = vmatprep.subr.bf16.mxu1 %v400_v1 }
   0xe   :  { %354 = vmatpush3.bf16.msra.mxu0 %v375_v25 }
  0x10   :  { %338 = vmatpush3.bf16.msra.mxu1 %v369_v11 }
  0x11   :  { %339 = vmatprep.subr.bf16.mxu1 %v400_v1 }
  0x14   :  { %340 = vmatpush3.bf16.msra.mxu1 %v370_v12 }
  0x15   :  { %341 = vmatprep.subr.bf16.mxu1 %v400_v1 }
  0x18   :  { %342 = vmatpush3.bf16.msra.mxu1 %v371_v13 }
  0x19   :  { %343 = vmatprep.subr.bf16.mxu1 %v400_v1 }
  0x1c   :  { %344 = vmatpush3.bf16.msra.mxu1 %v372_v14 }
  0x1d   :  { %345 = vmatprep.subr.bf16.mxu1 %v400_v1 }
  0x20   :  { %346 = vmatpush3.bf16.msra.mxu1 %v373_v15 }
  0xdb   :  { %v89_v18 = vpop.f32.mrb[0].mxu0 }
  0xdc   :  { %v90_v19 = vadd.f32 %v295_v17, %v89_v18  ;;  %v329_v20 = vpop.f32.mrb[1].mxu0 }
  0xdd   :  { %v92_v21 = vpop.f32.mrb[2].mxu0 }
  0xde   :  { %v95_v22 = vmax.f32 %v90_v19, 0.0  ;;  %v330_v23 = vpop.f32.mrb[3].mxu0 }
  0xe0   :  { %v96_v24 = vpack.c.bf16 %v95_v22, %v95_v22 }
  0xe2   :  { %348 = vmatmul.mubr.bf16.vlgmr.msra.gmra.mrb[0].mxu1 %v96_v24 }
 0x1b5   :  { %v202_v27 = vpop.f32.mrb[0].mxu1 }
 0x1b6   :  { %v203_v28 = vadd.f32 %v298_v26, %v202_v27  ;;  %v349_v29 = vpop.f32.mrb[1].mxu1 }
 0x1b7   :  { %v205_v30 = vpop.f32.mrb[2].mxu1 }
 0x1b8   :  { %v208_v31 = vmax.f32 %v203_v28, 0.0  ;;  %v350_v32 = vpop.f32.mrb[3].mxu1 }
 0x1ba   :  { %v209_v33 = vpack.c.bf16 %v208_v31, %v208_v31 }
 0x1bc   :  { %356 = vmatmul.mubr.msk.bf16.vlgmr.msra.gmra.mrb[4].mxu0 %vm233_vm4, %v209_v33 }
 0x28f   :  { %v271_v35 = vpop.f32.mrb[4].mxu0 }
 0x290   :  { %v272_v36 = vadd.f32 %v307_v34, %v271_v35  ;;  %v357_v37 = vpop.f32.mrb[5].mxu0 }
 0x291   :  { %v274_v38 = vpop.f32.mrb[6].mxu0 }
 0x292   :  { %278 = vst.msk [vmem:[#allocation2] sm:$0xff] %vm277_vm5, %v272_v36  ;;  %v358_v39 = vpop.f32.mrb[7].mxu0 }
 0x293   :  { %283 = vsyncadd [#allocation3], 96  ;;  %s403_s4 = smov [#allocation2]  }
 0x294   :  { %s284_s5 = sshll.u32 %s403_s4, 4  ;;  %s285_s5 = int_to_ptr.vmem [resolvable:$true] %s284_s5 }
 0x295   :  { %s376_s27 = scalar_lea.vmem %s285_s5, 32  ;;  %s380_s28 = scalar_lea.vmem %s285_s5, 128 }
 0x296   :  { %p377_p0 = scmp.ne.s32.totalorder %s285_s5, %s376_s27  ;;  %p381_p1 = scmp.lt.s32.totalorder %s285_s5, %s285_s5 }
 0x297   :  { %p382_p2 = scmp.lt.s32.totalorder %s380_s28, %s376_s27 }
 0x299   :  { %p383_p3 = por %p382_p2, %p381_p1 }
 0x29b   :  { %p384_p4 = pnand %p383_p3, %p377_p0 }
 0x29d   :  { %387 = shalt.err (!%p384_p4)
}
 0x29e   :  { %s388_s1 = scalar_lea.hbm %s513_s7, 32 }
 0x29f   :  { %p389_p5 = scmp.ne.s32.totalorder %s513_s7, %s388_s1  ;;  %p392_p6 = scmp.lt.u32.totalorder %s388_s1, %s513_s7 }
 0x2a1   :  { %p394_p7 = pnand %p392_p6, %p389_p5 }
 0x2a3   :  { %397 = shalt.err (!%p394_p7)
}
 0x2a4   :  { %s404_s10 = smov 32   ;;  %s405_s11 = smov 2  }
 0x2a5   :  { %290 = dma.vmem_to_hbm [thread:$0]  %s285_s5, 32, %s513_s7, [#allocation3], %s404_s10, %s404_s10, %s405_s11  }
 0x2a6   :  { %398 = dma.done.wait [#allocation3], 128  }
 0x2a7   :  { %399 = vsyncadd [#allocation3], 4294967168 }
 0x2a8   :  { %294 = vsyncpa [#allocation3], 1 }

</bundles_post_ra>
